<compile_context>
chip_gen: v7x
topology: tpu7x:2x2x1
jax: 0.10.0
libtpu: 0.0.40
codegen_flags: <defaults>
</compile_context>

<pallas_src>
import jax
import jax.numpy as jnp
from jax import lax
from jax.experimental import pallas as pl
from jax.experimental.pallas import tpu as pltpu


def _mlp_kernel(x_ref, w_ref, b_ref, o_ref):
    # x_ref: (tm, K), w_ref: (N, K)  [PyTorch layout: out x in], b_ref: (1, N)
    # Contract x's axis 1 with w's axis 1 (i.e. x @ W.T) without materializing
    # a transposed weight copy.
    acc = lax.dot_general(
        x_ref[...],
        w_ref[...],
        dimension_numbers=(((1,), (1,)), ((), ())),
        preferred_element_type=jnp.float32,
    )
    acc = acc + b_ref[...].astype(jnp.float32)
    # Fused ReLU (cheap VPU op, hidden under MXU/DMA slots).
    o_ref[...] = jnp.maximum(acc, 0.0).astype(o_ref.dtype)


def _pick_row_tile(m):
    """Largest convenient M-tile that divides M (keeps blocks (8,128)-friendly)."""
    for tm in (512, 256, 128, 64, 32, 16, 8):
        if m % tm == 0:
            return tm
    return m  # fall back to a single full-M block


def mlp_forward(x, weight, bias):
    """x: (..., input_dim); weight: (output_dim, input_dim); bias: (output_dim,)."""
    *lead, k = x.shape
    n = weight.shape[0]
    assert weight.shape == (n, k)

    m = 1
    for d in lead:
        m *= d
    x2 = x.reshape(m, k)
    b2 = bias.reshape(1, n)

    tm = _pick_row_tile(m)
    grid = (m // tm,)

    out = pl.pallas_call(
        _mlp_kernel,
        out_shape=jax.ShapeDtypeStruct((m, n), x.dtype),
        grid_spec=pltpu.PrefetchScalarGridSpec(
            num_scalar_prefetch=0,
            grid=grid,
            in_specs=[
                # Streamed activation tiles.
                pl.BlockSpec((tm, k), lambda i: (i, 0)),
                # Weight + bias: same block for every grid step -> VMEM-resident.
                pl.BlockSpec((n, k), lambda i: (0, 0)),
                pl.BlockSpec((1, n), lambda i: (0, 0)),
            ],
            out_specs=pl.BlockSpec((tm, n), lambda i: (i, 0)),
        ),
        compiler_params=pltpu.CompilerParams(
            # Independent row tiles: allow megacore sharding on v7x.
            dimension_semantics=("parallel",),
        ),
    )(x2, weight, b2)

    return out.reshape(*lead, n)


if __name__ == "__main__":
    # Small config consistent with the module: batch=2, seq=8,
    # input_dim=32, output_dim=64.
    # TODO(synk): production feature dims should be padded to multiples of 128
    # for lane-dense stores / full MXU occupancy; at these toy sizes the last
    # dim equals the full array extent so the (8,128) rule is still satisfied.
    B, S, IN, OUT = 2, 8, 32, 64
    key = jax.random.PRNGKey(0)
    k1, k2, k3 = jax.random.split(key, 3)

    x = jax.random.normal(k1, (B, S, IN), dtype=jnp.float32)
    weight = jax.random.normal(k2, (OUT, IN), dtype=jnp.float32) * 0.02  # (out, in)
    bias = jax.random.normal(k3, (OUT,), dtype=jnp.float32) * 0.02

    out = mlp_forward(x, weight, bias)
    out = jax.block_until_ready(out)

    # Reference check in plain JAX.
    ref = jnp.maximum(x.reshape(-1, IN) @ weight.T + bias, 0.0).reshape(B, S, OUT)
    assert out.shape == (B, S, OUT)
    assert jnp.allclose(out, ref, atol=1e-5, rtol=1e-5), "mismatch vs reference"

    print("KERNEL_OK")
</pallas_src>

<mosaic_0001>
module attributes {stable_mosaic.version = 11 : i64} {
  func.func @_mlp_kernel(%arg0: i32, %arg1: memref<16x32xf32, #tpu.memory_space<vmem>>, %arg2: memref<64x32xf32, #tpu.memory_space<vmem>>, %arg3: memref<1x64xf32, #tpu.memory_space<vmem>>, %arg4: memref<16x64xf32, #tpu.memory_space<vmem>>) attributes {dimension_semantics = [#tpu.dimension_semantics<parallel>], iteration_bounds = array<i64: 1>, scalar_prefetch = 0 : i64, scratch_operands = 0 : i64, tpu.core_type = #tpu.core_type<tc>, window_params = [{transform_indices = @transform_0, window_bounds = array<i64: 16, 32>}, {pipeline_mode = #tpu.pipeline_mode<synchronous>, transform_indices = @transform_1, window_bounds = array<i64: 64, 32>}, {pipeline_mode = #tpu.pipeline_mode<synchronous>, transform_indices = @transform_2, window_bounds = array<i64: 1, 64>}, {transform_indices = @transform_3, window_bounds = array<i64: 16, 64>}]} {
    %c0 = arith.constant 0 : index
    %c0_0 = arith.constant 0 : index
    %0 = vector.load %arg1[%c0, %c0_0] : memref<16x32xf32, #tpu.memory_space<vmem>>, vector<16x32xf32>
    %c0_1 = arith.constant 0 : index
    %c0_2 = arith.constant 0 : index
    %1 = vector.load %arg2[%c0_1, %c0_2] : memref<64x32xf32, #tpu.memory_space<vmem>>, vector<64x32xf32>
    %cst = arith.constant dense<0.000000e+00> : vector<16x64xf32>
    %2 = tpu.matmul %0, %1, %cst {dimension_numbers = #tpu.dot_dimension_numbers<[1], [1], [0], [0], [0, 0, 1, 0], [], []>} : vector<16x32xf32>, vector<64x32xf32>, vector<16x64xf32> -> vector<16x64xf32>
    %c0_3 = arith.constant 0 : index
    %c0_4 = arith.constant 0 : index
    %3 = vector.load %arg3[%c0_3, %c0_4] : memref<1x64xf32, #tpu.memory_space<vmem>>, vector<1x64xf32>
    %4 = vector.broadcast %3 : vector<1x64xf32> to vector<16x64xf32>
    %5 = arith.addf %2, %4 : vector<16x64xf32>
    %cst_5 = arith.constant 0.000000e+00 : f32
    %6 = vector.broadcast %cst_5 : f32 to vector<16x64xf32>
    %7 = arith.maximumf %5, %6 : vector<16x64xf32>
    %c0_6 = arith.constant 0 : index
    %c0_7 = arith.constant 0 : index
    %8 = vector.load %arg4[%c0_6, %c0_7] : memref<16x64xf32, #tpu.memory_space<vmem>>, vector<16x64xf32>
    tpu.vector_store %arg4[%c0_6, %c0_7], %7 {strides = array<i32>} : memref<16x64xf32, #tpu.memory_space<vmem>>, vector<16x64xf32>,
    return
  }
  func.func @transform_0(%arg0: i32) -> (i32, i32) {
    %c0_i32 = arith.constant 0 : i32
    %c0_i32_0 = arith.constant 0 : i32
    return %arg0, %c0_i32 : i32, i32
  }
  func.func @transform_1(%arg0: i32) -> (i32, i32) {
    %c0_i32 = arith.constant 0 : i32
    %c0_i32_0 = arith.constant 0 : i32
    %c0_i32_1 = arith.constant 0 : i32
    return %c0_i32, %c0_i32_0 : i32, i32
  }
  func.func @transform_2(%arg0: i32) -> (i32, i32) {
    %c0_i32 = arith.constant 0 : i32
    %c0_i32_0 = arith.constant 0 : i32
    %c0_i32_1 = arith.constant 0 : i32
    return %c0_i32, %c0_i32_0 : i32, i32
  }
  func.func @transform_3(%arg0: i32) -> (i32, i32) {
    %c0_i32 = arith.constant 0 : i32
    %c0_i32_0 = arith.constant 0 : i32
    return %arg0, %c0_i32 : i32, i32
  }
}

</mosaic_0001>

<bundles_post_ra>
// kernel: tpu_custom_call.1
= control target key start
LH: loop header
LB: loop body
LE: loop exit
PB: predicated region body
PF: predicated region fallthrough
CT: control target
= control target key end

     0   :  { %vm32_vm0 = vcmask 261120   ;;  %s342_s0 = inlined_call_operand.vmem [shape: f32[16,32], index: 0, kind: input, shape index: {}]   ;;  %s343_s1 = inlined_call_operand.vmem [shape: f32[64,32], index: 1, kind: input, shape index: {}]   ;;  %s344_s2 = inlined_call_operand.vmem [shape: f32[1,64], index: 2, kind: input, shape index: {}]   ;;  %s345_s3 = inlined_call_operand.hbm [shape: f32[16,64], index: 3, kind: output, shape index: {}]  }
   0x1   :  { %v17_v0 = vld [vmem:[%s343_s1] sm:$0xff]  ;;  %v18_v1 = vld [vmem:[%s343_s1 + $0x8] sm:$0xff]  ;;  %v19_v2 = vld [vmem:[%s343_s1 + $0x10] sm:$0xff] }
   0x2   :  { %v199_v3 = vpack.c.bf16 %v18_v1, %v17_v0  ;;  %vm284_vm1 = vmpackc.low %vm32_vm0, %vm32_vm0  ;;  %v20_v5 = vld [vmem:[%s343_s1 + $0x18] sm:$0xff]  ;;  %v15_v7 = vld [vmem:[%s342_s0] sm:$0xff] }
   0x3   :  { %v205_v6 = vpack.c.bf16 %v20_v5, %v19_v2 }
   0x4   :  { %201 = vmatprep.subr.msk.bf16.mxu0 %vm284_vm1, %v199_v3 }
   0x5   :  { %8 = vsyncpa [#allocation3], 0  ;;  %204 = vmatpush3.bf16.xpose.msk.msra.mxu0 %vm284_vm1, %v199_v3  ;;  %196 = vmatprep.mubr.msk.f32.mxu0 %vm32_vm0, %v15_v7  ;;  %v21_v8 = vld [vmem:[%s343_s1 + $0x20] sm:$0xff]  ;;  %v22_v9 = vld [vmem:[%s343_s1 + $0x28] sm:$0xff]  ;;  %vm140_vm2 = vcmask 523264  }
   0x6   :  { %207 = vmatprep.subr.msk.bf16.mxu0 %vm284_vm1, %v205_v6  ;;  %v211_v10 = vpack.c.bf16 %v22_v9, %v21_v8  ;;  %v23_v11 = vld [vmem:[%s343_s1 + $0x30] sm:$0xff]  ;;  %v24_v12 = vld [vmem:[%s343_s1 + $0x38] sm:$0xff]  ;;  %v16_v14 = vld [vmem:[%s342_s0 + $0x8] sm:$0xff]  ;;  %s250_s1 = smov [#allocation2]  }
   0x7   :  { %v217_v13 = vpack.c.bf16 %v24_v12, %v23_v11  ;;  %v159_v15 = vld [vmem:[%s344_s2] ss:$0 sm:$0xff]  ;;  %s148_s7 = sshll.u32 %s250_s1, 4  ;;  %s149_s7 = int_to_ptr.vmem [resolvable:$true] %s148_s7 }
   0x8   :  { %s226_s8 = scalar_lea.vmem %s149_s7, 256  ;;  %p231_p1 = scmp.lt.s32.totalorder %s149_s7, %s149_s7 }
   0x9   :  { %p227_p0 = scmp.ne.s32.totalorder %s149_s7, %s226_s8  ;;  %p232_p2 = scmp.lt.s32.totalorder %s226_s8, %s226_s8 }
   0xb   :  { %p233_p3 = por %p232_p2, %p231_p1 }
   0xd   :  { %210 = vmatpush3.bf16.xpose.msk.msra.mxu0 %vm284_vm1, %v205_v6  ;;  %p234_p4 = pnand %p233_p3, %p227_p0 }
   0xe   :  { %213 = vmatprep.subr.msk.bf16.mxu0 %vm284_vm1, %v211_v10 }
  0x15   :  { %216 = vmatpush3.bf16.xpose.msk.msra.mxu0 %vm284_vm1, %v211_v10 }
  0x16   :  { %219 = vmatprep.subr.msk.bf16.mxu0 %vm284_vm1, %v217_v13 }
  0x1d   :  { %222 = vmatpush3.bf16.xpose.msk.msra.mxu0 %vm284_vm1, %v217_v13 }
  0x24   :  { %197 = vmatmul.mubr.msk.f32.vlgmr.msra.gmra.mrb[0].mxu0 %vm32_vm0, %v16_v14 }
  0xf7   :  { %v198_v16 = vpop.f32.mrb[0].mxu0 }
  0xf8   :  { %v135_v17 = vadd.f32 %v198_v16, %v159_v15  ;;  %v129_v18 = vpop.f32.mrb[1].mxu0 }
  0xf9   :  { %v130_v19 = vadd.f32 %v159_v15, %v129_v18 }
  0xfa   :  { %v139_v20 = vmax.f32 %v135_v17, 0.0 }
  0xfb   :  { %v138_v21 = vmax.f32 %v130_v19, 0.0 }
  0xfc   :  { %142 = vst.msk [vmem:[#allocation2 + $0x8] sm:$0xff] %vm140_vm2, %v139_v20 }
  0xfd   :  { %141 = vst.msk [vmem:[#allocation2] sm:$0xff] %vm140_vm2, %v138_v21 }
  0xfe   :  { %237 = shalt.err (!%p234_p4)
}
  0xff   :  { %s238_s9 = scalar_lea.hbm %s345_s3, 256 }
 0x100   :  { %p239_p5 = scmp.ne.s32.totalorder %s345_s3, %s238_s9  ;;  %p242_p6 = scmp.lt.u32.totalorder %s238_s9, %s345_s3 }
 0x102   :  { %p244_p7 = pnand %p242_p6, %p239_p5 }
 0x104   :  { %247 = shalt.err (!%p244_p7)
}
 0x105   :  { %s251_s14 = smov 128   ;;  %s252_s15 = smov 8  }
 0x106   :  { %154 = dma.vmem_to_hbm [thread:$0]  %s149_s7, 256, %s345_s3, [#allocation3], %s251_s14, %s251_s14, %s252_s15  }
 0x107   :  { %248 = dma.done.wait [#allocation3], 256  }
 0x108   :  { %249 = vsyncadd [#allocation3], 4294967040 }
 0x109   :  { %158 = vsyncpa [#allocation3], 1 }

</bundles_post_ra>
